<compile_context>
chip_gen: v7x
topology: tpu7x:2x2x1
jax: 0.10.0
libtpu: 0.0.40
codegen_flags: <defaults>
</compile_context>

<pallas_src>
import functools
import math

import jax
import jax.numpy as jnp
from jax import lax
from jax.experimental import pallas as pl
from jax.experimental.pallas import tpu as pltpu


def _cosface_kernel(xn_ref, w_ref, label_ref, out_ref, *, s, m, class_tile):
    """One (batch-tile, class-tile) block of the CosFace head.

    xn_ref:    (TB, D)  row-L2-normalized input (f32 or bf16)
    w_ref:     (TC, D)  raw weight tile (f32 or bf16), streamed from HBM
    label_ref: (TB, 1)  int32 labels
    out_ref:   (TB, TC) f32 output tile
    """
    xn = xn_ref[...]
    w = w_ref[...]

    # Row-wise L2 normalization of the weight tile: sum-of-squares in f32,
    # one EUP rsqrt + a VPU multiply (no sqrt + two divides).
    w32 = w.astype(jnp.float32)
    inv_wn = lax.rsqrt(
        jnp.maximum(jnp.sum(w32 * w32, axis=-1, keepdims=True), 1e-24)
    )
    wn = (w32 * inv_wn).astype(xn.dtype)

    # cosine = xn @ wn.T expressed as a transpose-free contraction on D.
    cosine = lax.dot_general(
        xn,
        wn,
        dimension_numbers=(((1,), (1,)), ((), ())),
        preferred_element_type=jnp.float32,
    )

    # one_hot(label) restricted to this class tile.
    tile_start = pl.program_id(0) * class_tile
    cols = lax.broadcasted_iota(jnp.int32, cosine.shape, 1) + tile_start
    one_hot = (cols == label_ref[...]).astype(jnp.float32)

    # out = s * (one_hot*(cosine - m) + (1-one_hot)*cosine) = s*(cosine - m*one_hot)
    out_ref[...] = s * (cosine - m * one_hot)


def _choose_batch_tile(B):
    """Full batch if small; otherwise largest multiple of 8 (<=256) dividing B."""
    if B <= 256:
        return B
    for t in range(256, 7, -8):
        if B % t == 0:
            return t
    return B


def _choose_class_tile(C, D, tb, x_bytes, w_bytes, max_tile=1024,
                       budget_bytes=24 << 20):
    """Largest multiple of 128 dividing C that fits a conservative VMEM budget.

    Budget counts: 2x weight tile (double buffer) + 2x output tile + 2x resident
    normalized-x tile + labels.  Kept <= ~24 MiB so it is safe under the default
    scoped-VMEM limit on v5e/v6e (32/128 MiB) and v7x (32/64 MiB).
    """
    def fits(tc):
        need = (2 * tc * D * w_bytes      # weight double buffer
                + 2 * tb * tc * 4         # f32 output double buffer
                + 2 * tb * D * x_bytes    # resident normalized x
                + 2 * tb * 4)             # labels
        return need <= budget_bytes

    for tc in range(min(max_tile, C) - (min(max_tile, C) % 128), 0, -128):
        if C % tc == 0 and fits(tc):
            return tc
    # Fall back to the whole class axis as a single block (valid BlockSpec:
    # block dim equals the full array dim).
    return C


def cosface_forward(x, weight, label, *, s=64.0, m=0.35, class_tile=None,
                    compute_dtype=jnp.float32):
    """x: (B, D) f32, weight: (C, D) f32, label: (B,) int -> (B, C) f32."""
    B, D = x.shape
    C, D2 = weight.shape
    assert D == D2

    # --- Hoisted input normalization (was recomputed per class tile). ---
    x32 = x.astype(jnp.float32)
    inv_xn = lax.rsqrt(
        jnp.maximum(jnp.sum(x32 * x32, axis=1, keepdims=True), 1e-24)
    )
    xn = (x32 * inv_xn).astype(compute_dtype)

    # Stream the weight in the compute dtype (bf16 halves HBM traffic in this
    # bandwidth-bound kernel); normalization + accumulation stay f32 in-kernel.
    w_in = weight.astype(compute_dtype)
    label2d = label.reshape(B, 1).astype(jnp.int32)

    tb = _choose_batch_tile(B)
    if class_tile is None:
        class_tile = _choose_class_tile(
            C, D, tb,
            x_bytes=jnp.dtype(compute_dtype).itemsize,
            w_bytes=jnp.dtype(compute_dtype).itemsize,
        )
    assert C % class_tile == 0
    assert B % tb == 0

    kernel = functools.partial(_cosface_kernel, s=s, m=m, class_tile=class_tile)

    grid = (C // class_tile, B // tb)  # class axis outermost, batch innermost

    return pl.pallas_call(
        kernel,
        out_shape=jax.ShapeDtypeStruct((B, C), jnp.float32),
        grid_spec=pltpu.PrefetchScalarGridSpec(
            num_scalar_prefetch=0,
            grid=grid,
            in_specs=[
                pl.BlockSpec((tb, D), lambda j, i: (i, 0)),          # xn tile
                pl.BlockSpec((class_tile, D), lambda j, i: (j, 0)),  # weight tile
                pl.BlockSpec((tb, 1), lambda j, i: (i, 0)),          # labels
            ],
            out_specs=pl.BlockSpec((tb, class_tile), lambda j, i: (i, j)),
        ),
        compiler_params=pltpu.CompilerParams(
            # class axis sharded across TCs (v7x megacore); batch axis is the
            # inner sequential loop so the weight tile is not re-DMA'd.
            dimension_semantics=("parallel", "arbitrary"),
            vmem_limit_bytes=32 * 1024 * 1024,
        ),
    )(xn, w_in, label2d)


def xavier_uniform(key, shape, dtype=jnp.float32):
    # nn.init.xavier_uniform_ on (out_features, in_features)
    fan_out, fan_in = shape
    limit = math.sqrt(6.0 / (fan_in + fan_out))
    return jax.random.uniform(key, shape, dtype=dtype, minval=-limit, maxval=limit)


def cosface_reference(x, weight, label, *, s=64.0, m=0.35):
    xn = x / jnp.maximum(jnp.linalg.norm(x, axis=1, keepdims=True), 1e-12)
    wn = weight / jnp.maximum(jnp.linalg.norm(weight, axis=1, keepdims=True), 1e-12)
    cosine = xn @ wn.T
    one_hot = jax.nn.one_hot(label, weight.shape[0], dtype=jnp.float32)
    return s * (one_hot * (cosine - m) + (1.0 - one_hot) * cosine)


if __name__ == "__main__":
    in_features = 128
    out_features = 256
    batch = 8
    s, m = 64.0, 0.35

    key = jax.random.PRNGKey(0)
    kx, kw, kl = jax.random.split(key, 3)

    x = jax.random.normal(kx, (batch, in_features), dtype=jnp.float32)
    weight = xavier_uniform(kw, (out_features, in_features))
    label = jax.random.randint(kl, (batch,), 0, out_features, dtype=jnp.int32)

    ref = cosface_reference(x, weight, label, s=s, m=m)

    # f32 path: exact semantics, tight tolerance.
    out_f32 = cosface_forward(x, weight, label, s=s, m=m,
                              compute_dtype=jnp.float32)
    out_f32 = jax.block_until_ready(out_f32)
    assert out_f32.shape == (batch, out_features)
    assert jnp.allclose(out_f32, ref, atol=1e-3, rtol=1e-3), "f32 mismatch vs reference"

    # bf16 weight-streaming path: halves weight HBM traffic; looser tolerance
    # (cosine is O(1), bf16 rounding ~2e-3, scaled by s=64).
    out_bf16 = cosface_forward(x, weight, label, s=s, m=m,
                               compute_dtype=jnp.bfloat16)
    out_bf16 = jax.block_until_ready(out_bf16)
    assert out_bf16.shape == (batch, out_features)
    assert jnp.allclose(out_bf16, ref, atol=0.4, rtol=2e-2), "bf16 mismatch vs reference"

    print("KERNEL_OK")
</pallas_src>

<mosaic_0001>
module attributes {stable_mosaic.version = 11 : i64} {
  func.func @_cosface_kernel(%arg0: i32, %arg1: i32, %arg2: memref<8x128xf32, #tpu.memory_space<vmem>>, %arg3: memref<256x128xf32, #tpu.memory_space<vmem>>, %arg4: memref<8x1xi32, #tpu.memory_space<vmem>>, %arg5: memref<8x256xf32, #tpu.memory_space<vmem>>) attributes {dimension_semantics = [#tpu.dimension_semantics<parallel>, #tpu.dimension_semantics<arbitrary>], iteration_bounds = array<i64: 1, 1>, scalar_prefetch = 0 : i64, scratch_operands = 0 : i64, tpu.core_type = #tpu.core_type<tc>, window_params = [{transform_indices = @transform_0, window_bounds = array<i64: 8, 128>}, {transform_indices = @transform_1, window_bounds = array<i64: 256, 128>}, {transform_indices = @transform_2, window_bounds = array<i64: 8, 1>}, {transform_indices = @transform_3, window_bounds = array<i64: 8, 256>}]} {
    %c0 = arith.constant 0 : index
    %c0_0 = arith.constant 0 : index
    %0 = vector.load %arg2[%c0, %c0_0] : memref<8x128xf32, #tpu.memory_space<vmem>>, vector<8x128xf32>
    %c0_1 = arith.constant 0 : index
    %c0_2 = arith.constant 0 : index
    %1 = vector.load %arg3[%c0_1, %c0_2] : memref<256x128xf32, #tpu.memory_space<vmem>>, vector<256x128xf32>
    %2 = arith.mulf %1, %1 : vector<256x128xf32>
    %cst = arith.constant dense<0.000000e+00> : vector<256xf32>
    %3 = vector.multi_reduction <add>, %2, %cst [1] : vector<256x128xf32> to vector<256xf32>
    %4 = vector.shape_cast %3 : vector<256xf32> to vector<256x1xf32>
    %cst_3 = arith.constant 1.000000e-24 : f32
    %5 = vector.broadcast %cst_3 : f32 to vector<256x1xf32>
    %6 = arith.maximumf %4, %5 : vector<256x1xf32>
    %7 = math.rsqrt %6 : vector<256x1xf32>
    %8 = vector.broadcast %7 : vector<256x1xf32> to vector<256x128xf32>
    %9 = arith.mulf %1, %8 : vector<256x128xf32>
    %cst_4 = arith.constant dense<0.000000e+00> : vector<8x256xf32>
    %10 = tpu.matmul %0, %9, %cst_4 {dimension_numbers = #tpu.dot_dimension_numbers<[1], [1], [0], [0], [0, 0, 1, 0], [], []>} : vector<8x128xf32>, vector<256x128xf32>, vector<8x256xf32> -> vector<8x256xf32>
    %c256_i32 = arith.constant 256 : i32
    %11 = arith.muli %arg0, %c256_i32 : i32
    %12 = tpu.iota {dimensions = array<i32: 1>} : vector<8x256xi32>
    %13 = vector.broadcast %11 : i32 to vector<8x256xi32>
    %14 = arith.addi %12, %13 : vector<8x256xi32>
    %c0_5 = arith.constant 0 : index
    %c0_6 = arith.constant 0 : index
    %15 = vector.load %arg4[%c0_5, %c0_6] : memref<8x1xi32, #tpu.memory_space<vmem>>, vector<8x1xi32>
    %16 = vector.broadcast %15 : vector<8x1xi32> to vector<8x256xi32>
    %17 = arith.cmpi eq, %14, %16 : vector<8x256xi32>
    %18 = arith.extui %17 : vector<8x256xi1> to vector<8x256xi32>
    %19 = arith.sitofp %18 : vector<8x256xi32> to vector<8x256xf32>
    %cst_7 = arith.constant 3.500000e-01 : f32
    %20 = vector.broadcast %cst_7 : f32 to vector<8x256xf32>
    %21 = arith.mulf %20, %19 : vector<8x256xf32>
    %22 = arith.subf %10, %21 : vector<8x256xf32>
    %cst_8 = arith.constant 6.400000e+01 : f32
    %23 = vector.broadcast %cst_8 : f32 to vector<8x256xf32>
    %24 = arith.mulf %23, %22 : vector<8x256xf32>
    %c0_9 = arith.constant 0 : index
    %c0_10 = arith.constant 0 : index
    %25 = vector.load %arg5[%c0_9, %c0_10] : memref<8x256xf32, #tpu.memory_space<vmem>>, vector<8x256xf32>
    tpu.vector_store %arg5[%c0_9, %c0_10], %24 {strides = array<i32>} : memref<8x256xf32, #tpu.memory_space<vmem>>, vector<8x256xf32>,
    return
  }
  func.func @transform_0(%arg0: i32, %arg1: i32) -> (i32, i32) {
    %c0_i32 = arith.constant 0 : i32
    %c0_i32_0 = arith.constant 0 : i32
    return %arg1, %c0_i32 : i32, i32
  }
  func.func @transform_1(%arg0: i32, %arg1: i32) -> (i32, i32) {
    %c0_i32 = arith.constant 0 : i32
    %c0_i32_0 = arith.constant 0 : i32
    return %arg0, %c0_i32 : i32, i32
  }
  func.func @transform_2(%arg0: i32, %arg1: i32) -> (i32, i32) {
    %c0_i32 = arith.constant 0 : i32
    %c0_i32_0 = arith.constant 0 : i32
    return %arg1, %c0_i32 : i32, i32
  }
  func.func @transform_3(%arg0: i32, %arg1: i32) -> (i32, i32) {
    %c0_i32 = arith.constant 0 : i32
    return %arg1, %arg0 : i32, i32
  }
}

</mosaic_0001>

<bundles_post_ra>
// kernel: tpu_custom_call.1
= control target key start
LH: loop header
LB: loop body
LE: loop exit
PB: predicated region body
PF: predicated region fallthrough
CT: control target
= control target key end

     0   :  { %8 = vsyncpa [#allocation3], 0  ;;  %s772_s0 = inlined_call_operand.vmem [shape: f32[8,128], index: 0, kind: input, shape index: {}]   ;;  %s773_s1 = inlined_call_operand.hbm [shape: f32[256,128], index: 1, kind: input, shape index: {}]   ;;  %s774_s2 = inlined_call_operand.vmem [shape: s32[8,1], index: 2, kind: input, shape index: {}]   ;;  %s775_s3 = inlined_call_operand.hbm [shape: f32[8,256], index: 3, kind: output, shape index: {}]  }
   0x1   :  { %9 = vsyncpa [#allocation4], 0  ;;  %s552_s12 = smov [#allocation2]   ;;  %s504_s16 = scalar_lea.hbm %s773_s1, 4096 }
   0x2   :  { %s17_s13 = sshll.u32 %s552_s12, 4  ;;  %p505_p0 = scmp.ne.s32.totalorder %s773_s1, %s504_s16  ;;  %s18_s13 = int_to_ptr.vmem [resolvable:$true] %s17_s13 }
   0x3   :  { %p508_p1 = scmp.lt.u32.totalorder %s504_s16, %s773_s1 }
   0x5   :  { %p510_p2 = pnand %p508_p1, %p505_p0 }
   0x7   :  { %513 = shalt.err (!%p510_p2)
}
   0x8   :  { %s514_s21 = scalar_lea.vmem %s18_s13, 4096  ;;  %p519_p4 = scmp.lt.s32.totalorder %s18_s13, %s18_s13 }
   0x9   :  { %p515_p3 = scmp.ne.s32.totalorder %s18_s13, %s514_s21  ;;  %p520_p5 = scmp.lt.s32.totalorder %s514_s21, %s514_s21 }
   0xb   :  { %p521_p6 = por %p520_p5, %p519_p4 }
   0xd   :  { %p522_p7 = pnand %p521_p6, %p515_p3 }
   0xf   :  { %525 = shalt.err (!%p522_p7)
}
  0x10   :  { %s553_s22 = smov 128   ;;  %s554_s23 = smov 8  }
  0x11   :  { %23 = dma.hbm_to_vmem [thread:$0]  %s773_s1, 4096, %s18_s13, [#allocation3], %s553_s22, %s553_s22, %s554_s23  }
  0x12   :  { %548 = dma.done.wait [#allocation3], 4096  }
  0x13   :  { %549 = vsyncadd [#allocation3], 4294963200  ;;  %v590_v0 = vld [vmem:[#allocation2 + $0x80] sm:$0xff]  ;;  %v594_v2 = vld [vmem:[#allocation2 + $0x88] sm:$0xff] }
  0x14   :  { %v592_v1 = vld [vmem:[#allocation2] sm:$0xff]  ;;  %v78_v3 = vmul.f32 %v590_v0, %v590_v0  ;;  %v600_v5 = vld [vmem:[#allocation2 + $0x8] sm:$0xff]  ;;  %v79_v6 = vmul.f32 %v594_v2, %v594_v2  ;;  %v606_v8 = vld [vmem:[#allocation2 + $0x90] sm:$0xff] }
  0x15   :  { %v62_v4 = vmul.f32 %v592_v1, %v592_v1  ;;  %v63_v7 = vmul.f32 %v600_v5, %v600_v5  ;;  %v608_v9 = vld [vmem:[#allocation2 + $0x98] sm:$0xff]  ;;  %v80_v10 = vmul.f32 %v606_v8, %v606_v8  ;;  %v614_v12 = vld [vmem:[#allocation2 + $0x10] sm:$0xff]  ;;  %v622_v16 = vld [vmem:[#allocation2 + $0xa0] sm:$0xff] }
  0x16   :  { %126 = vadd.xlane.f32.xlu0 %v78_v3  ;;  %v81_v11 = vmul.f32 %v608_v9, %v608_v9  ;;  %v616_v13 = vld [vmem:[#allocation2 + $0x18] sm:$0xff]  ;;  %v64_v14 = vmul.f32 %v614_v12, %v614_v12  ;;  %v624_v17 = vld [vmem:[#allocation2 + $0xa8] sm:$0xff]  ;;  %v82_v18 = vmul.f32 %v622_v16, %v622_v16  ;;  %v630_v20 = vld [vmem:[#allocation2 + $0x20] sm:$0xff] }
  0x17   :  { %94 = vadd.xlane.f32.xlu1 %v62_v4  ;;  %v65_v15 = vmul.f32 %v616_v13, %v616_v13  ;;  %v83_v19 = vmul.f32 %v624_v17, %v624_v17  ;;  %v632_v21 = vld [vmem:[#allocation2 + $0x28] sm:$0xff]  ;;  %v66_v22 = vmul.f32 %v630_v20, %v630_v20  ;;  %v638_v24 = vld [vmem:[#allocation2 + $0xb0] sm:$0xff]  ;;  %v640_v25 = vld [vmem:[#allocation2 + $0xb8] sm:$0xff] }
  0x18   :  { %v67_v23 = vmul.f32 %v632_v21, %v632_v21  ;;  %v84_v26 = vmul.f32 %v638_v24, %v638_v24  ;;  %v85_v27 = vmul.f32 %v640_v25, %v640_v25  ;;  %v646_v28 = vld [vmem:[#allocation2 + $0x30] sm:$0xff]  ;;  %v648_v29 = vld [vmem:[#allocation2 + $0x38] sm:$0xff]  ;;  %v654_v32 = vld [vmem:[#allocation2 + $0xc0] sm:$0xff] }
  0x19   :  { %v68_v30 = vmul.f32 %v646_v28, %v646_v28  ;;  %v69_v31 = vmul.f32 %v648_v29, %v648_v29  ;;  %v656_v33 = vld [vmem:[#allocation2 + $0xc8] sm:$0xff]  ;;  %v86_v34 = vmul.f32 %v654_v32, %v654_v32  ;;  %v662_v36 = vld [vmem:[#allocation2 + $0x40] sm:$0xff]  ;;  %v670_v40 = vld [vmem:[#allocation2 + $0xd0] sm:$0xff] }
  0x1a   :  { %128 = vadd.xlane.f32.xlu0 %v79_v6  ;;  %v87_v35 = vmul.f32 %v656_v33, %v656_v33  ;;  %v664_v37 = vld [vmem:[#allocation2 + $0x48] sm:$0xff]  ;;  %v70_v38 = vmul.f32 %v662_v36, %v662_v36  ;;  %v672_v41 = vld [vmem:[#allocation2 + $0xd8] sm:$0xff]  ;;  %v88_v42 = vmul.f32 %v670_v40, %v670_v40  ;;  %v678_v44 = vld [vmem:[#allocation2 + $0x50] sm:$0xff]  ;;  %v555_v6 = vmov 0  }
  0x1b   :  { %96 = vadd.xlane.f32.xlu1 %v63_v7  ;;  %v71_v39 = vmul.f32 %v664_v37, %v664_v37  ;;  %v89_v43 = vmul.f32 %v672_v41, %v672_v41  ;;  %v680_v45 = vld [vmem:[#allocation2 + $0x58] sm:$0xff]  ;;  %v72_v46 = vmul.f32 %v678_v44, %v678_v44  ;;  %v686_v48 = vld [vmem:[#allocation2 + $0xe0] sm:$0xff]  ;;  %v688_v49 = vld [vmem:[#allocation2 + $0xe8] sm:$0xff]  ;;  %439 = vset.pattern.permute.xlu0 %v555_v6 }
  0x1c   :  { %v73_v47 = vmul.f32 %v680_v45, %v680_v45  ;;  %v90_v50 = vmul.f32 %v686_v48, %v686_v48  ;;  %v91_v51 = vmul.f32 %v688_v49, %v688_v49  ;;  %v694_v52 = vld [vmem:[#allocation2 + $0x60] sm:$0xff]  ;;  %v696_v53 = vld [vmem:[#allocation2 + $0x68] sm:$0xff]  ;;  %v702_v56 = vld [vmem:[#allocation2 + $0xf0] sm:$0xff] }
  0x1d   :  { %v74_v54 = vmul.f32 %v694_v52, %v694_v52  ;;  %v75_v55 = vmul.f32 %v696_v53, %v696_v53  ;;  %v704_v57 = vld [vmem:[#allocation2 + $0xf8] sm:$0xff]  ;;  %v92_v58 = vmul.f32 %v702_v56, %v702_v56  ;;  %v710_v60 = vld [vmem:[#allocation2 + $0x70] sm:$0xff]  ;;  %v721_v3 = vld [vmem:[%s772_s0] sm:$0xff]  ;;  %s557_s0 = smov [#allocation5]  }
  0x1e   :  { %130 = vadd.xlane.f32.xlu0 %v80_v10  ;;  %v93_v59 = vmul.f32 %v704_v57, %v704_v57  ;;  %v712_v61 = vld [vmem:[#allocation2 + $0x78] sm:$0xff]  ;;  %v76_v62 = vmul.f32 %v710_v60, %v710_v60  ;;  %399 = vmatprep.mubr.f32.mxu0 %v721_v3  ;;  %v332_v4 = vld [vmem:[%s774_s2] sm:$0xff]  ;;  %s356_s2 = sshll.u32 %s557_s0, 4  ;;  %s357_s2 = int_to_ptr.vmem [resolvable:$true] %s356_s2 }
  0x1f   :  { %132 = vadd.xlane.f32.xlu1 %v81_v11  ;;  %v77_v63 = vmul.f32 %v712_v61, %v712_v61  ;;  %s526_s29 = scalar_lea.vmem %s357_s2, 256  ;;  %p531_p9 = scmp.lt.s32.totalorder %s357_s2, %s357_s2 }
  0x20   :  { %p527_p8 = scmp.ne.s32.totalorder %s357_s2, %s526_s29  ;;  %p532_p10 = scmp.lt.s32.totalorder %s526_s29, %s526_s29 }
  0x22   :  { %98 = vadd.xlane.f32.xlu0 %v64_v14  ;;  %p533_p11 = por %p532_p10, %p531_p9 }
  0x23   :  { %100 = vadd.xlane.f32.xlu1 %v65_v15 }
  0x24   :  { %p534_p12 = pnand %p533_p11, %p527_p8 }
  0x26   :  { %134 = vadd.xlane.f32.xlu0 %v82_v18 }
  0x27   :  { %136 = vadd.xlane.f32.xlu1 %v83_v19 }
  0x2a   :  { %102 = vadd.xlane.f32.xlu0 %v66_v22 }
  0x2b   :  { %104 = vadd.xlane.f32.xlu1 %v67_v23 }
  0x2e   :  { %138 = vadd.xlane.f32.xlu0 %v84_v26 }
  0x2f   :  { %140 = vadd.xlane.f32.xlu1 %v85_v27 }
  0x32   :  { %106 = vadd.xlane.f32.xlu0 %v68_v30 }
  0x33   :  { %108 = vadd.xlane.f32.xlu1 %v69_v31 }
  0x36   :  { %142 = vadd.xlane.f32.xlu0 %v86_v34 }
  0x37   :  { %144 = vadd.xlane.f32.xlu1 %v87_v35 }
  0x3a   :  { %110 = vadd.xlane.f32.xlu0 %v70_v38 }
  0x3b   :  { %112 = vadd.xlane.f32.xlu1 %v71_v39 }
  0x3e   :  { %146 = vadd.xlane.f32.xlu0 %v88_v42 }
  0x3f   :  { %148 = vadd.xlane.f32.xlu1 %v89_v43 }
  0x42   :  { %114 = vadd.xlane.f32.xlu0 %v72_v46 }
  0x43   :  { %116 = vadd.xlane.f32.xlu1 %v73_v47 }
  0x46   :  { %150 = vadd.xlane.f32.xlu0 %v90_v50 }
  0x47   :  { %152 = vadd.xlane.f32.xlu1 %v91_v51 }
  0x4a   :  { %118 = vadd.xlane.f32.xlu0 %v74_v54 }
  0x4b   :  { %120 = vadd.xlane.f32.xlu1 %v75_v55 }
  0x4e   :  { %154 = vadd.xlane.f32.xlu0 %v92_v58 }
  0x4f   :  { %156 = vadd.xlane.f32.xlu1 %v93_v59 }
  0x52   :  { %122 = vadd.xlane.f32.xlu0 %v76_v62 }
  0x53   :  { %124 = vadd.xlane.f32.xlu1 %v77_v63 }
  0x68   :  { %334 = vperm.xlu0 %439, %v332_v4  }
  0xa3   :  { %v127_v7 = vpop.xlane.xlu0 %126 }
  0xa4   :  { %v95_v10 = vpop.xlane.xlu1 %94  ;;  %v174_v11 = vmax.f32 %v127_v7, 1e-24 }
  0xa5   :  { %v158_v14 = vmax.f32 %v95_v10, 1e-24 }
  0xa6   :  { %440 = vrsqrt.f32 %v174_v11 }
  0xa7   :  { %v129_v15 = vpop.xlane.xlu0 %128  ;;  %442 = vrsqrt.f32 %v158_v14 }
  0xa8   :  { %v97_v18 = vpop.xlane.xlu1 %96  ;;  %v175_v19 = vmax.f32 %v129_v15, 1e-24 }
  0xa9   :  { %v159_v22 = vmax.f32 %v97_v18, 1e-24 }
  0xaa   :  { %444 = vrsqrt.f32 %v175_v19 }
  0xab   :  { %446 = vrsqrt.f32 %v159_v22  ;;  %v131_v23 = vpop.xlane.xlu0 %130 }
  0xac   :  { %v133_v26 = vpop.xlane.xlu1 %132  ;;  %v176_v27 = vmax.f32 %v131_v23, 1e-24 }
  0xad   :  { %v177_v30 = vmax.f32 %v133_v26, 1e-24 }
  0xae   :  { %448 = vrsqrt.f32 %v176_v27 }
  0xaf   :  { %450 = vrsqrt.f32 %v177_v30  ;;  %v99_v31 = vpop.xlane.xlu0 %98 }
  0xb0   :  { %v101_v34 = vpop.xlane.xlu1 %100  ;;  %v160_v35 = vmax.f32 %v99_v31, 1e-24  ;;  %v441_v39 = vpop.eup %440 }
  0xb1   :  { %v161_v38 = vmax.f32 %v101_v34, 1e-24  ;;  %v443_v42 = vpop.eup %442  ;;  %v238_v55 = vmul.f32 %v441_v39, %v590_v0 }
  0xb2   :  { %452 = vrsqrt.f32 %v160_v35  ;;  %v222_v59 = vmul.f32 %v443_v42, %v592_v1 }
  0xb3   :  { %454 = vrsqrt.f32 %v161_v38  ;;  %v135_v43 = vpop.xlane.xlu0 %134 }
  0xb4   :  { %v137_v46 = vpop.xlane.xlu1 %136  ;;  %v445_v47 = vpop.eup %444  ;;  %v178_v50 = vmax.f32 %v135_v43, 1e-24 }
  0xb5   :  { %v179_v51 = vmax.f32 %v137_v46, 1e-24  ;;  %v447_v54 = vpop.eup %446  ;;  %v239_v58 = vmul.f32 %v445_v47, %v594_v2 }
  0xb6   :  { %456 = vrsqrt.f32 %v178_v50  ;;  %v223_v62 = vmul.f32 %v447_v54, %v600_v5 }
  0xb7   :  { %458 = vrsqrt.f32 %v179_v51  ;;  %v103_v63 = vpop.xlane.xlu0 %102  ;;  %v401_v6 = vpack.c.bf16 %v239_v58, %v238_v55 }
  0xb8   :  { %v105_v4 = vpop.xlane.xlu1 %104  ;;  %v449_v7 = vpop.eup %448  ;;  %v162_v10 = vmax.f32 %v103_v63, 1e-24  ;;  %v403_v14 = vpack.c.bf16 %v223_v62, %v222_v59 }
  0xb9   :  { %v163_v11 = vmax.f32 %v105_v4, 1e-24  ;;  %v451_v15 = vpop.eup %450  ;;  %402 = vmatprep.subr.bf16.mxu0 %v401_v6  ;;  %v240_v18 = vmul.f32 %v449_v7, %v606_v8 }
  0xba   :  { %460 = vrsqrt.f32 %v162_v10  ;;  %404 = vmatpush3.bf16.xpose.msra.mxu0 %v403_v14  ;;  %v241_v0 = vmul.f32 %v451_v15, %v608_v9 }
  0xbb   :  { %462 = vrsqrt.f32 %v163_v11  ;;  %v139_v1 = vpop.xlane.xlu0 %138 }
  0xbc   :  { %v141_v2 = vpop.xlane.xlu1 %140  ;;  %v453_v5 = vpop.eup %452  ;;  %v180_v19 = vmax.f32 %v139_v1, 1e-24  ;;  %v405_v23 = vpack.c.bf16 %v241_v0, %v240_v18 }
  0xbd   :  { %v181_v22 = vmax.f32 %v141_v2, 1e-24  ;;  %v455_v26 = vpop.eup %454  ;;  %v224_v27 = vmul.f32 %v453_v5, %v614_v12 }
  0xbe   :  { %464 = vrsqrt.f32 %v180_v19  ;;  %406 = vmatprep.subr.bf16.mxu0 %v405_v23  ;;  %v225_v30 = vmul.f32 %v455_v26, %v616_v13 }
  0xbf   :  { %466 = vrsqrt.f32 %v181_v22  ;;  %v107_v8 = vpop.xlane.xlu0 %106 }
  0xc0   :  { %v109_v31 = vpop.xlane.xlu1 %108  ;;  %v457_v34 = vpop.eup %456  ;;  %v164_v35 = vmax.f32 %v107_v8, 1e-24  ;;  %v407_v38 = vpack.c.bf16 %v225_v30, %v224_v27 }
  0xc1   :  { %v165_v9 = vmax.f32 %v109_v31, 1e-24  ;;  %v459_v39 = vpop.eup %458  ;;  %v242_v42 = vmul.f32 %v457_v34, %v622_v16 }
  0xc2   :  { %468 = vrsqrt.f32 %v164_v35  ;;  %408 = vmatpush3.bf16.xpose.msra.mxu0 %v407_v38  ;;  %v243_v43 = vmul.f32 %v459_v39, %v624_v17 }
  0xc3   :  { %470 = vrsqrt.f32 %v165_v9  ;;  %v143_v12 = vpop.xlane.xlu0 %142 }
  0xc4   :  { %v145_v46 = vpop.xlane.xlu1 %144  ;;  %v461_v47 = vpop.eup %460  ;;  %v182_v50 = vmax.f32 %v143_v12, 1e-24  ;;  %v409_v51 = vpack.c.bf16 %v243_v43, %v242_v42 }
  0xc5   :  { %v183_v13 = vmax.f32 %v145_v46, 1e-24  ;;  %v463_v54 = vpop.eup %462  ;;  %v226_v55 = vmul.f32 %v461_v47, %v630_v20 }
  0xc6   :  { %472 = vrsqrt.f32 %v182_v50  ;;  %410 = vmatprep.subr.bf16.mxu0 %v409_v51  ;;  %v227_v58 = vmul.f32 %v463_v54, %v632_v21 }
  0xc7   :  { %474 = vrsqrt.f32 %v183_v13  ;;  %v111_v16 = vpop.xlane.xlu0 %110 }
  0xc8   :  { %v113_v59 = vpop.xlane.xlu1 %112  ;;  %v465_v62 = vpop.eup %464  ;;  %v166_v63 = vmax.f32 %v111_v16, 1e-24  ;;  %v411_v4 = vpack.c.bf16 %v227_v58, %v226_v55 }
  0xc9   :  { %v167_v17 = vmax.f32 %v113_v59, 1e-24  ;;  %v467_v6 = vpop.eup %466  ;;  %v244_v7 = vmul.f32 %v465_v62, %v638_v24 }
  0xca   :  { %476 = vrsqrt.f32 %v166_v63  ;;  %412 = vmatpush3.bf16.xpose.msra.mxu0 %v411_v4  ;;  %v245_v10 = vmul.f32 %v467_v6, %v640_v25 }
  0xcb   :  { %478 = vrsqrt.f32 %v167_v17  ;;  %v147_v20 = vpop.xlane.xlu0 %146 }
  0xcc   :  { %v149_v11 = vpop.xlane.xlu1 %148  ;;  %v469_v14 = vpop.eup %468  ;;  %v184_v15 = vmax.f32 %v147_v20, 1e-24  ;;  %v413_v18 = vpack.c.bf16 %v245_v10, %v244_v7 }
  0xcd   :  { %v185_v21 = vmax.f32 %v149_v11, 1e-24  ;;  %v471_v0 = vpop.eup %470  ;;  %v228_v1 = vmul.f32 %v469_v14, %v646_v28 }
  0xce   :  { %480 = vrsqrt.f32 %v184_v15  ;;  %414 = vmatprep.subr.bf16.mxu0 %v413_v18  ;;  %v229_v2 = vmul.f32 %v471_v0, %v648_v29 }
  0xcf   :  { %482 = vrsqrt.f32 %v185_v21  ;;  %v115_v24 = vpop.xlane.xlu0 %114 }
  0xd0   :  { %v117_v5 = vpop.xlane.xlu1 %116  ;;  %v473_v19 = vpop.eup %472  ;;  %v168_v22 = vmax.f32 %v115_v24, 1e-24  ;;  %v415_v23 = vpack.c.bf16 %v229_v2, %v228_v1 }
  0xd1   :  { %v169_v25 = vmax.f32 %v117_v5, 1e-24  ;;  %v475_v26 = vpop.eup %474  ;;  %v246_v27 = vmul.f32 %v473_v19, %v654_v32 }
  0xd2   :  { %484 = vrsqrt.f32 %v168_v22  ;;  %416 = vmatpush3.bf16.xpose.msra.mxu0 %v415_v23  ;;  %v247_v30 = vmul.f32 %v475_v26, %v656_v33 }
  0xd3   :  { %486 = vrsqrt.f32 %v169_v25  ;;  %v151_v28 = vpop.xlane.xlu0 %150 }
  0xd4   :  { %v153_v8 = vpop.xlane.xlu1 %152  ;;  %v477_v31 = vpop.eup %476  ;;  %v186_v34 = vmax.f32 %v151_v28, 1e-24  ;;  %v417_v35 = vpack.c.bf16 %v247_v30, %v246_v27 }
  0xd5   :  { %v187_v29 = vmax.f32 %v153_v8, 1e-24  ;;  %v479_v9 = vpop.eup %478  ;;  %v230_v38 = vmul.f32 %v477_v31, %v662_v36 }
  0xd6   :  { %488 = vrsqrt.f32 %v186_v34  ;;  %418 = vmatprep.subr.bf16.mxu0 %v417_v35  ;;  %v231_v39 = vmul.f32 %v479_v9, %v664_v37 }
  0xd7   :  { %490 = vrsqrt.f32 %v187_v29  ;;  %v119_v32 = vpop.xlane.xlu0 %118 }
  0xd8   :  { %v121_v42 = vpop.xlane.xlu1 %120  ;;  %v481_v43 = vpop.eup %480  ;;  %v170_v12 = vmax.f32 %v119_v32, 1e-24  ;;  %v419_v46 = vpack.c.bf16 %v231_v39, %v230_v38 }
  0xd9   :  { %v171_v33 = vmax.f32 %v121_v42, 1e-24  ;;  %v483_v47 = vpop.eup %482  ;;  %v248_v50 = vmul.f32 %v481_v43, %v670_v40 }
  0xda   :  { %492 = vrsqrt.f32 %v170_v12  ;;  %420 = vmatpush3.bf16.xpose.msra.mxu0 %v419_v46  ;;  %v249_v13 = vmul.f32 %v483_v47, %v672_v41 }
  0xdb   :  { %494 = vrsqrt.f32 %v171_v33  ;;  %v155_v36 = vpop.xlane.xlu0 %154 }
  0xdc   :  { %v157_v51 = vpop.xlane.xlu1 %156  ;;  %v485_v54 = vpop.eup %484  ;;  %v188_v55 = vmax.f32 %v155_v36, 1e-24  ;;  %v421_v58 = vpack.c.bf16 %v249_v13, %v248_v50 }
  0xdd   :  { %v189_v37 = vmax.f32 %v157_v51, 1e-24  ;;  %v487_v16 = vpop.eup %486  ;;  %v232_v59 = vmul.f32 %v485_v54, %v678_v44 }
  0xde   :  { %496 = vrsqrt.f32 %v188_v55  ;;  %422 = vmatprep.subr.bf16.mxu0 %v421_v58  ;;  %v233_v62 = vmul.f32 %v487_v16, %v680_v45 }
  0xdf   :  { %498 = vrsqrt.f32 %v189_v37  ;;  %v123_v40 = vpop.xlane.xlu0 %122 }
  0xe0   :  { %v125_v63 = vpop.xlane.xlu1 %124  ;;  %v489_v17 = vpop.eup %488  ;;  %v172_v4 = vmax.f32 %v123_v40, 1e-24  ;;  %v423_v6 = vpack.c.bf16 %v233_v62, %v232_v59 }
  0xe1   :  { %v173_v41 = vmax.f32 %v125_v63, 1e-24  ;;  %v491_v7 = vpop.eup %490  ;;  %v250_v10 = vmul.f32 %v489_v17, %v686_v48 }
  0xe2   :  { %500 = vrsqrt.f32 %v172_v4  ;;  %424 = vmatpush3.bf16.xpose.msra.mxu0 %v423_v6  ;;  %v251_v20 = vmul.f32 %v491_v7, %v688_v49 }
  0xe3   :  { %502 = vrsqrt.f32 %v173_v41 }
  0xe4   :  { %v493_v44 = vpop.eup %492  ;;  %v425_v11 = vpack.c.bf16 %v251_v20, %v250_v10 }
  0xe5   :  { %v495_v14 = vpop.eup %494  ;;  %v234_v45 = vmul.f32 %v493_v44, %v694_v52 }
  0xe6   :  { %426 = vmatprep.subr.bf16.mxu0 %v425_v11  ;;  %v235_v15 = vmul.f32 %v495_v14, %v696_v53  ;;  %v326_v53 = vlaneseq }
  0xe7   :  { %v335_v23 = vpop.permute.xlu0 %334 }
  0xe8   :  { %v497_v21 = vpop.eup %496  ;;  %v427_v18 = vpack.c.bf16 %v235_v15, %v234_v45  ;;  %v327_v22 = vand.u32 127, %v326_v53 }
  0xe9   :  { %v499_v0 = vpop.eup %498  ;;  %v252_v1 = vmul.f32 %v497_v21, %v702_v56  ;;  %v556_v56 = vmov 0.0  }
  0xea   :  { %428 = vmatpush3.bf16.xpose.msra.mxu0 %v427_v18  ;;  %v253_v48 = vmul.f32 %v499_v0, %v704_v57  ;;  %v328_v25 = vadd.s32 128, %v327_v22  ;;  %vm336_vm0 = vcmp.eq.s32.totalorder %v327_v22, %v335_v23 }
  0xeb   :  { %v365_v57 = vsel %vm336_vm0, 1.0, %v556_v56 }
  0xec   :  { %v501_v2 = vpop.eup %500  ;;  %v429_v24 = vpack.c.bf16 %v253_v48, %v252_v1  ;;  %vm337_vm1 = vcmp.eq.s32.totalorder %v328_v25, %v335_v23  ;;  %v342_v27 = vmul.f32 0.35, %v365_v57 }
  0xed   :  { %v503_v49 = vpop.eup %502  ;;  %v236_v5 = vmul.f32 %v501_v2, %v710_v60  ;;  %v366_v26 = vsel %vm337_vm1, 1.0, %v556_v56 }
  0xee   :  { %430 = vmatprep.subr.bf16.mxu0 %v429_v24  ;;  %v237_v19 = vmul.f32 %v503_v49, %v712_v61  ;;  %v343_v30 = vmul.f32 0.35, %v366_v26 }
  0xf0   :  { %v431_v52 = vpack.c.bf16 %v237_v19, %v236_v5 }
  0xf2   :  { %432 = vmatpush3.bf16.xpose.msra.mxu0 %v431_v52 }
  0xf9   :  { %400 = vmatmul.mubr.f32.vlgmr.msra.gmra.mrb[0].mxu0 %v721_v3 }
 0x1cc   :  { %v320_v28 = vpop.f32.mrb[0].mxu0 }
 0x1cd   :  { %v344_v60 = vsub.f32 %v320_v28, %v342_v27  ;;  %v322_v8 = vpop.f32.mrb[1].mxu0 }
 0x1ce   :  { %v345_v61 = vsub.f32 %v322_v8, %v343_v30 }
 0x1cf   :  { %v346_v31 = vmul.f32 64.0, %v344_v60 }
 0x1d0   :  { %v347_v34 = vmul.f32 64.0, %v345_v61 }
 0x1d1   :  { %348 = vst [vmem:[#allocation5] sm:$0xff] %v346_v31 }
 0x1d2   :  { %349 = vst [vmem:[#allocation5 + $0x8] sm:$0xff] %v347_v34 }
 0x1d3   :  { %537 = shalt.err (!%p534_p12)
}
 0x1d4   :  { %s538_s5 = scalar_lea.hbm %s775_s3, 256 }
 0x1d5   :  { %p539_p13 = scmp.ne.s32.totalorder %s775_s3, %s538_s5  ;;  %p542_p0 = scmp.lt.u32.totalorder %s538_s5, %s775_s3 }
 0x1d7   :  { %p544_p1 = pnand %p542_p0, %p539_p13 }
 0x1d9   :  { %547 = shalt.err (!%p544_p1)
}
 0x1da   :  { %359 = dma.vmem_to_hbm [thread:$0]  %s357_s2, 256, %s775_s3, [#allocation4]  }
 0x1db   :  { %550 = dma.done.wait [#allocation4], 256  }
 0x1dc   :  { %551 = vsyncadd [#allocation4], 4294967040 }
 0x1dd   :  { %363 = vsyncpa [#allocation3], 1 }
 0x1de   :  { %364 = vsyncpa [#allocation4], 1 }

</bundles_post_ra>
